<compile_context>
chip_gen: v7x
topology: tpu7x:2x2x1
jax: 0.10.0
libtpu: 0.0.40
codegen_flags: <defaults>
</compile_context>

<pallas_src>
import jax
import jax.numpy as jnp
from jax.experimental import pallas as pl
from jax.experimental.pallas import tpu as pltpu

_LANE = 128
_NEG_BIG = -1e30                    # pad-logit bias -> exp underflows to exactly 0
_VMEM_BUDGET = 40 * 1024 * 1024     # conservative per-TensorCore budget (v7x: 64 MiB/TC)


def _round_up(x, m):
    return ((x + m - 1) // m) * m


def _vmem_estimate_bytes(tb, d_in, d_h_pad, c_pad, w_bytes):
    """Rough per-step VMEM footprint: double-buffered I/O tiles + (double-buffered)
    resident weight blocks + elementwise temporaries."""
    x_io = 2 * tb * d_in * 4                                   # f32 x tile, 2 buffers
    o_io = 2 * tb * c_pad * 4                                  # f32 out tile, 2 buffers
    wts = 2 * (d_in * d_h_pad + d_h_pad * c_pad) * w_bytes     # constant blocks: 2 buffers each
    bias = 2 * (d_h_pad + c_pad) * 4
    tmps = tb * (3 * d_h_pad + 4 * c_pad) * 4                  # h (f32+bf16), logits/exp/result
    return x_io + o_io + wts + bias + tmps


def feature_kernel(x_ref, w1_ref, b1_ref, w2_ref, b2_ref, o_ref):
    # Cast x to the matmul dtype *inside* the kernel (x streams from HBM as f32).
    x = x_ref[...].astype(w1_ref.dtype)
    # hidden = relu(x @ W1 + b1): MXU matmul with f32 accumulation, f32 bias/relu.
    h = jnp.dot(x, w1_ref[...], preferred_element_type=jnp.float32) + b1_ref[...]
    h = jnp.maximum(h, 0.0)
    # logits = hidden @ W2 + b2  (hidden re-cast to the weight dtype for the MXU).
    logits = jnp.dot(h.astype(w2_ref.dtype), w2_ref[...],
                     preferred_element_type=jnp.float32) + b2_ref[...]
    # Numerically-stable softmax over the lane axis. Padded class columns hold a
    # -1e30 bias, so exp(pad - m) == 0 and they add nothing to the denominator.
    # Exact normalization: one f32 divide on the [tb, 1] denominator column, then
    # a broadcast multiply -> rows sum to 1 to f32 rounding.
    m = jnp.max(logits, axis=-1, keepdims=True)
    e = jnp.exp(logits - m)
    denom = jnp.sum(e, axis=-1, keepdims=True)
    o_ref[...] = (e * (1.0 / denom)).astype(o_ref.dtype)


def feature_forward(x, w1, b1, w2, b2, *, block_batch=512, use_bf16_matmul=True):
    """x: [B, origin_dim]; w1: [origin_dim, inter]; b1: [1, inter];
    w2: [inter, classes]; b2: [1, classes]  ->  [B, classes] (f32 softmax)."""
    B, d_in = x.shape
    d_h = w1.shape[1]
    classes = w2.shape[1]

    # --- Pad hidden dim and classes to lane-dense widths (multiples of 128). ---
    d_h_pad = _round_up(d_h, _LANE)
    c_pad = _round_up(classes, _LANE)
    if d_h_pad != d_h:
        # Zero-pad: relu(0 + 0) = 0 hidden columns contribute nothing to dot #2.
        w1 = jnp.pad(w1, ((0, 0), (0, d_h_pad - d_h)))
        b1 = jnp.pad(b1, ((0, 0), (0, d_h_pad - d_h)))
        w2 = jnp.pad(w2, ((0, d_h_pad - d_h), (0, 0)))
    if c_pad != classes:
        w2 = jnp.pad(w2, ((0, 0), (0, c_pad - classes)))
        # Pad bias stays f32 -1e30 so padded logits carry zero softmax mass.
        b2 = jnp.pad(b2, ((0, 0), (0, c_pad - classes)), constant_values=_NEG_BIG)

    if use_bf16_matmul:
        # Only the resident weights are cast in the wrapper; x stays f32 and is
        # cast in-kernel. Biases / accumulation / softmax stay f32 (v5e has no
        # bf16 VPU/EUP, so this is the safe and fast choice there too).
        w1 = w1.astype(jnp.bfloat16)
        w2 = w2.astype(jnp.bfloat16)
    w_bytes = 2 if use_bf16_matmul else 4

    # --- Batch tile: prefer fat tiles (up to block_batch rows), multiple of 16
    # when possible (bf16 sublane packing), sized against an explicit VMEM budget
    # that is conservative for v7x's 64 MiB/TC with batch-parallel megacore.
    if B >= 16:
        tb = min(block_batch, _round_up(B, 16))
        tb = max(16, (tb // 16) * 16)
    else:
        tb = _round_up(B, 8)
    while tb > 16 and _vmem_estimate_bytes(tb, d_in, d_h_pad, c_pad, w_bytes) > _VMEM_BUDGET:
        tb = max(16, ((tb // 2) // 16) * 16)

    est = _vmem_estimate_bytes(tb, d_in, d_h_pad, c_pad, w_bytes)
    vmem_limit = int(min(max(est + est // 4 + (2 << 20), 32 << 20), 60 << 20))

    # --- No wrapper-side batch pad: ragged last block (softmax is row-wise, OOB
    # tail rows are row-isolated and their stores are masked). Saves HBM passes.
    grid = (pl.cdiv(B, tb),)

    out = pl.pallas_call(
        feature_kernel,
        out_shape=jax.ShapeDtypeStruct((B, c_pad), jnp.float32),
        grid_spec=pltpu.PrefetchScalarGridSpec(
            num_scalar_prefetch=0,
            grid=grid,
            in_specs=[
                # batch-tiled activations (f32 stream, cast in-kernel)
                pl.BlockSpec((tb, d_in), lambda i: (i, 0)),
                # weights / biases: same block every step -> stay VMEM-resident
                pl.BlockSpec((d_in, d_h_pad), lambda i: (0, 0)),
                pl.BlockSpec((1, d_h_pad), lambda i: (0, 0)),
                pl.BlockSpec((d_h_pad, c_pad), lambda i: (0, 0)),
                pl.BlockSpec((1, c_pad), lambda i: (0, 0)),
            ],
            out_specs=pl.BlockSpec((tb, c_pad), lambda i: (i, 0)),
        ),
        compiler_params=pltpu.CompilerParams(
            # independent batch tiles -> shard across v7x's two TensorCores
            dimension_semantics=("parallel",),
            vmem_limit_bytes=vmem_limit,
        ),
    )(x, w1, b1, w2, b2)

    # TODO(synk): single-buffering the constant weight blocks (pipeline_mode=
    # pl.Buffered(1)) would halve their VMEM footprint on v7x; the budget above
    # conservatively assumes the default 2 buffers instead.
    return out[:, :classes] if c_pad != classes else out


if __name__ == "__main__":
    # Small shapes consistent with the module's forward.
    batch, origin_dim, intermediate_dim, classes = 8, 32, 64, 16

    key = jax.random.PRNGKey(0)
    kx, kw1, kb1, kw2, kb2, kx2 = jax.random.split(key, 6)

    x = jax.random.normal(kx, (batch, origin_dim), dtype=jnp.float32)

    # Deterministic synthetic parameters (uniform like torch.nn.Linear init).
    lim1 = 1.0 / jnp.sqrt(origin_dim)
    w1 = jax.random.uniform(kw1, (origin_dim, intermediate_dim),
                            minval=-lim1, maxval=lim1, dtype=jnp.float32)
    b1 = jax.random.uniform(kb1, (1, intermediate_dim),
                            minval=-lim1, maxval=lim1, dtype=jnp.float32)
    lim2 = 1.0 / jnp.sqrt(intermediate_dim)
    w2 = jax.random.uniform(kw2, (intermediate_dim, classes),
                            minval=-lim2, maxval=lim2, dtype=jnp.float32)
    b2 = jax.random.uniform(kb2, (1, classes),
                            minval=-lim2, maxval=lim2, dtype=jnp.float32)

    def reference(xv, bf16):
        if bf16:
            xc, w1c, w2c = (xv.astype(jnp.bfloat16), w1.astype(jnp.bfloat16),
                            w2.astype(jnp.bfloat16))
        else:
            xc, w1c, w2c = xv, w1, w2
        h = jnp.maximum(jnp.dot(xc, w1c, preferred_element_type=jnp.float32) + b1, 0.0)
        logits = jnp.dot(h.astype(w1c.dtype), w2c,
                         preferred_element_type=jnp.float32) + b2
        return jax.nn.softmax(logits, axis=-1)

    # 1) Default (bf16 MXU inputs, f32 accumulation / softmax).
    out = jax.block_until_ready(feature_forward(x, w1, b1, w2, b2))
    assert out.shape == (batch, classes)
    assert jnp.allclose(out, reference(x, True), atol=2e-3, rtol=2e-3)
    assert jnp.allclose(out, reference(x, False), atol=1e-2, rtol=1e-2)  # vs full-f32 semantics
    assert jnp.allclose(jnp.sum(out, axis=-1), 1.0, atol=1e-3)

    # 2) Full-f32 matmul path.
    out_f32 = jax.block_until_ready(
        feature_forward(x, w1, b1, w2, b2, use_bf16_matmul=False))
    assert jnp.allclose(out_f32, reference(x, False), atol=2e-3, rtol=2e-3)
    assert jnp.allclose(jnp.sum(out_f32, axis=-1), 1.0, atol=1e-3)

    # 3) Ragged batch (B % tb != 0): multi-step grid with a masked tail block.
    x2 = jax.random.normal(kx2, (40, origin_dim), dtype=jnp.float32)
    out2 = jax.block_until_ready(
        feature_forward(x2, w1, b1, w2, b2, block_batch=16))
    assert out2.shape == (40, classes)
    assert jnp.allclose(out2, reference(x2, True), atol=2e-3, rtol=2e-3)
    assert jnp.allclose(jnp.sum(out2, axis=-1), 1.0, atol=1e-3)

    print("KERNEL_OK")
</pallas_src>

<mosaic_0001>
module attributes {stable_mosaic.version = 11 : i64} {
  func.func @feature_kernel(%arg0: i32, %arg1: memref<8x32xf32, #tpu.memory_space<vmem>>, %arg2: memref<32x128xbf16, #tpu.memory_space<vmem>>, %arg3: memref<1x128xf32, #tpu.memory_space<vmem>>, %arg4: memref<128x128xbf16, #tpu.memory_space<vmem>>, %arg5: memref<1x128xf32, #tpu.memory_space<vmem>>, %arg6: memref<8x128xf32, #tpu.memory_space<vmem>>) attributes {dimension_semantics = [#tpu.dimension_semantics<parallel>], iteration_bounds = array<i64: 1>, scalar_prefetch = 0 : i64, scratch_operands = 0 : i64, tpu.core_type = #tpu.core_type<tc>, window_params = [{transform_indices = @transform_0, window_bounds = array<i64: 8, 32>}, {pipeline_mode = #tpu.pipeline_mode<synchronous>, transform_indices = @transform_1, window_bounds = array<i64: 32, 128>}, {pipeline_mode = #tpu.pipeline_mode<synchronous>, transform_indices = @transform_2, window_bounds = array<i64: 1, 128>}, {pipeline_mode = #tpu.pipeline_mode<synchronous>, transform_indices = @transform_3, window_bounds = array<i64: 128, 128>}, {pipeline_mode = #tpu.pipeline_mode<synchronous>, transform_indices = @transform_4, window_bounds = array<i64: 1, 128>}, {transform_indices = @transform_5, window_bounds = array<i64: 8, 128>}]} {
    %c0 = arith.constant 0 : index
    %c0_0 = arith.constant 0 : index
    %0 = vector.load %arg1[%c0, %c0_0] : memref<8x32xf32, #tpu.memory_space<vmem>>, vector<8x32xf32>
    %1 = arith.truncf %0 : vector<8x32xf32> to vector<8x32xbf16>
    %c0_1 = arith.constant 0 : index
    %c0_2 = arith.constant 0 : index
    %2 = vector.load %arg2[%c0_1, %c0_2] : memref<32x128xbf16, #tpu.memory_space<vmem>>, vector<32x128xbf16>
    %cst = arith.constant dense<0.000000e+00> : vector<8x128xf32>
    %3 = tpu.matmul %1, %2, %cst {dimension_numbers = #tpu.dot_dimension_numbers<[1], [0], [0], [1], [0, 0, 1, 1], [], []>} : vector<8x32xbf16>, vector<32x128xbf16>, vector<8x128xf32> -> vector<8x128xf32>
    %c0_3 = arith.constant 0 : index
    %c0_4 = arith.constant 0 : index
    %4 = vector.load %arg3[%c0_3, %c0_4] : memref<1x128xf32, #tpu.memory_space<vmem>>, vector<1x128xf32>
    %5 = vector.broadcast %4 : vector<1x128xf32> to vector<8x128xf32>
    %6 = arith.addf %3, %5 : vector<8x128xf32>
    %cst_5 = arith.constant 0.000000e+00 : f32
    %7 = vector.broadcast %cst_5 : f32 to vector<8x128xf32>
    %8 = arith.maximumf %6, %7 : vector<8x128xf32>
    %9 = arith.truncf %8 : vector<8x128xf32> to vector<8x128xbf16>
    %c0_6 = arith.constant 0 : index
    %c0_7 = arith.constant 0 : index
    %10 = vector.load %arg4[%c0_6, %c0_7] : memref<128x128xbf16, #tpu.memory_space<vmem>>, vector<128x128xbf16>
    %cst_8 = arith.constant dense<0.000000e+00> : vector<8x128xf32>
    %11 = tpu.matmul %9, %10, %cst_8 {dimension_numbers = #tpu.dot_dimension_numbers<[1], [0], [0], [1], [0, 0, 1, 1], [], []>} : vector<8x128xbf16>, vector<128x128xbf16>, vector<8x128xf32> -> vector<8x128xf32>
    %c0_9 = arith.constant 0 : index
    %c0_10 = arith.constant 0 : index
    %12 = vector.load %arg5[%c0_9, %c0_10] : memref<1x128xf32, #tpu.memory_space<vmem>>, vector<1x128xf32>
    %13 = vector.broadcast %12 : vector<1x128xf32> to vector<8x128xf32>
    %14 = arith.addf %11, %13 : vector<8x128xf32>
    %cst_11 = arith.constant dense<0xFF800000> : vector<8xf32>
    %15 = vector.multi_reduction <maximumf>, %14, %cst_11 [1] : vector<8x128xf32> to vector<8xf32>
    %16 = vector.shape_cast %15 : vector<8xf32> to vector<8x1xf32>
    %17 = vector.broadcast %16 : vector<8x1xf32> to vector<8x128xf32>
    %18 = arith.subf %14, %17 : vector<8x128xf32>
    %19 = math.exp %18 : vector<8x128xf32>
    %cst_12 = arith.constant dense<0.000000e+00> : vector<8xf32>
    %20 = vector.multi_reduction <add>, %19, %cst_12 [1] : vector<8x128xf32> to vector<8xf32>
    %21 = vector.shape_cast %20 : vector<8xf32> to vector<8x1xf32>
    %cst_13 = arith.constant 1.000000e+00 : f32
    %22 = vector.broadcast %cst_13 : f32 to vector<8x1xf32>
    %23 = arith.divf %22, %21 : vector<8x1xf32>
    %24 = vector.broadcast %23 : vector<8x1xf32> to vector<8x128xf32>
    %25 = arith.mulf %19, %24 : vector<8x128xf32>
    %c0_14 = arith.constant 0 : index
    %c0_15 = arith.constant 0 : index
    %26 = vector.load %arg6[%c0_14, %c0_15] : memref<8x128xf32, #tpu.memory_space<vmem>>, vector<8x128xf32>
    tpu.vector_store %arg6[%c0_14, %c0_15], %25 {strides = array<i32>} : memref<8x128xf32, #tpu.memory_space<vmem>>, vector<8x128xf32>,
    return
  }
  func.func @transform_0(%arg0: i32) -> (i32, i32) {
    %c0_i32 = arith.constant 0 : i32
    %c0_i32_0 = arith.constant 0 : i32
    return %arg0, %c0_i32 : i32, i32
  }
  func.func @transform_1(%arg0: i32) -> (i32, i32) {
    %c0_i32 = arith.constant 0 : i32
    %c0_i32_0 = arith.constant 0 : i32
    %c0_i32_1 = arith.constant 0 : i32
    return %c0_i32, %c0_i32_0 : i32, i32
  }
  func.func @transform_2(%arg0: i32) -> (i32, i32) {
    %c0_i32 = arith.constant 0 : i32
    %c0_i32_0 = arith.constant 0 : i32
    %c0_i32_1 = arith.constant 0 : i32
    return %c0_i32, %c0_i32_0 : i32, i32
  }
  func.func @transform_3(%arg0: i32) -> (i32, i32) {
    %c0_i32 = arith.constant 0 : i32
    %c0_i32_0 = arith.constant 0 : i32
    %c0_i32_1 = arith.constant 0 : i32
    return %c0_i32, %c0_i32_0 : i32, i32
  }
  func.func @transform_4(%arg0: i32) -> (i32, i32) {
    %c0_i32 = arith.constant 0 : i32
    %c0_i32_0 = arith.constant 0 : i32
    %c0_i32_1 = arith.constant 0 : i32
    return %c0_i32, %c0_i32_0 : i32, i32
  }
  func.func @transform_5(%arg0: i32) -> (i32, i32) {
    %c0_i32 = arith.constant 0 : i32
    %c0_i32_0 = arith.constant 0 : i32
    return %arg0, %c0_i32 : i32, i32
  }
}

</mosaic_0001>

<bundles_post_ra>
// kernel: tpu_custom_call.1
= control target key start
LH: loop header
LB: loop body
LE: loop exit
PB: predicated region body
PF: predicated region fallthrough
CT: control target
= control target key end

     0   :  { %10 = vsyncpa [#allocation3], 0  ;;  %s537_s0 = inlined_call_operand.hbm [shape: f32[8,32], index: 0, kind: input, shape index: {}]   ;;  %s538_s1 = inlined_call_operand.hbm [shape: bf16[32,128], index: 1, kind: input, shape index: {}]   ;;  %s539_s2 = inlined_call_operand.vmem [shape: f32[1,128], index: 2, kind: input, shape index: {}]   ;;  %s540_s3 = inlined_call_operand.hbm [shape: bf16[128,128], index: 3, kind: input, shape index: {}]   ;;  %s541_s4 = inlined_call_operand.vmem [shape: f32[1,128], index: 4, kind: input, shape index: {}]   ;;  %s542_s5 = inlined_call_operand.hbm [shape: f32[8,128], index: 5, kind: output, shape index: {}]  }
   0x1   :  { %11 = vsyncpa [#allocation6], 0 }
   0x2   :  { %12 = vsyncpa [#allocation4], 0  ;;  %s439_s18 = smov [#allocation5]   ;;  %s345_s22 = scalar_lea.hbm %s538_s1, 256 }
   0x3   :  { %s28_s19 = sshll.u32 %s439_s18, 4  ;;  %p346_p0 = scmp.ne.s32.totalorder %s538_s1, %s345_s22  ;;  %s29_s19 = int_to_ptr.vmem [resolvable:$true] %s28_s19 }
   0x4   :  { %p349_p1 = scmp.lt.u32.totalorder %s345_s22, %s538_s1 }
   0x6   :  { %p351_p2 = pnand %p349_p1, %p346_p0 }
   0x8   :  { %354 = shalt.err (!%p351_p2)
}
   0x9   :  { %s355_s27 = scalar_lea.vmem %s29_s19, 256  ;;  %p360_p4 = scmp.lt.s32.totalorder %s29_s19, %s29_s19 }
   0xa   :  { %p356_p3 = scmp.ne.s32.totalorder %s29_s19, %s355_s27  ;;  %p361_p5 = scmp.lt.s32.totalorder %s355_s27, %s355_s27 }
   0xc   :  { %p362_p6 = por %p361_p5, %p360_p4 }
   0xe   :  { %p363_p7 = pnand %p362_p6, %p356_p3 }
  0x10   :  { %366 = shalt.err (!%p363_p7)
}
  0x11   :  { %s440_s28 = smov 64   ;;  %s441_s29 = smov 4  }
  0x12   :  { %34 = dma.hbm_to_vmem [thread:$0]  %s538_s1, 256, %s29_s19, [#allocation6], %s440_s28, %s440_s28, %s441_s29  }
  0x13   :  { %s442_s7 = smov [#allocation2]   ;;  %s443_s9 = smov [#allocation7]  }
  0x14   :  { %s19_s8 = sshll.u32 %s442_s7, 4  ;;  %s42_s10 = sshll.u32 %s443_s9, 4  ;;  %s20_s8 = int_to_ptr.vmem [resolvable:$true] %s19_s8  ;;  %s43_s10 = int_to_ptr.vmem [resolvable:$true] %s42_s10 }
  0x15   :  { %s367_s13 = scalar_lea.hbm %s537_s0, 128 }
  0x16   :  { %p368_p8 = scmp.ne.s32.totalorder %s537_s0, %s367_s13  ;;  %p371_p9 = scmp.lt.u32.totalorder %s367_s13, %s537_s0 }
  0x18   :  { %p373_p10 = pnand %p371_p9, %p368_p8 }
  0x1a   :  { %376 = shalt.err (!%p373_p10)
}
  0x1b   :  { %s377_s1 = scalar_lea.vmem %s20_s8, 128  ;;  %p382_p12 = scmp.lt.s32.totalorder %s20_s8, %s20_s8 }
  0x1c   :  { %p378_p11 = scmp.ne.s32.totalorder %s20_s8, %s377_s1  ;;  %p383_p13 = scmp.lt.s32.totalorder %s377_s1, %s377_s1 }
  0x1e   :  { %p384_p0 = por %p383_p13, %p382_p12 }
  0x20   :  { %p385_p1 = pnand %p384_p0, %p378_p11 }
  0x22   :  { %388 = shalt.err (!%p385_p1)
}
  0x23   :  { %22 = dma.hbm_to_vmem [thread:$0]  %s537_s0, 128, %s20_s8, [#allocation3]  }
  0x24   :  { %s389_s22 = scalar_lea.hbm %s540_s3, 1024 }
  0x25   :  { %p390_p2 = scmp.ne.s32.totalorder %s540_s3, %s389_s22  ;;  %p393_p3 = scmp.lt.u32.totalorder %s389_s22, %s540_s3 }
  0x27   :  { %p395_p4 = pnand %p393_p3, %p390_p2 }
  0x29   :  { %398 = shalt.err (!%p395_p4)
}
  0x2a   :  { %s399_s27 = scalar_lea.vmem %s43_s10, 1024  ;;  %p404_p6 = scmp.lt.s32.totalorder %s43_s10, %s43_s10 }
  0x2b   :  { %p400_p5 = scmp.ne.s32.totalorder %s43_s10, %s399_s27  ;;  %p405_p7 = scmp.lt.s32.totalorder %s399_s27, %s399_s27 }
  0x2d   :  { %p406_p8 = por %p405_p7, %p404_p6 }
  0x2f   :  { %p407_p9 = pnand %p406_p8, %p400_p5 }
  0x31   :  { %410 = shalt.err (!%p407_p9)
}
  0x32   :  { %48 = dma.hbm_to_vmem [thread:$0]  %s540_s3, 1024, %s43_s10, [#allocation6], %s440_s28, %s440_s28, %s441_s29  }
  0x33   :  { %433 = dma.done.wait [#allocation3], 128  }
  0x34   :  { %434 = vsyncadd [#allocation3], 4294967168 }
  0x35   :  { %435 = dma.done.wait [#allocation6], 1280  }
  0x36   :  { %436 = vsyncadd [#allocation6], 4294966016  ;;  %v444_v0 = vmov 0.0   ;;  %vm445_vm0 = vmmov 0   ;;  %v331_v1 = vld [vmem:[#allocation5] sm:$0xff]   ;;  %v332_v2 = vld [vmem:[#allocation5 + $0x8] sm:$0xff]  }
  0x37   :  { %295 = vmatprep.subr.bf16.mxu0 %v444_v0  ;;  %299 = vmatprep.mubr.msk.bf16.mxu0 %vm445_vm0, %v444_v0  ;;  %v61_v3 = vld [vmem:[#allocation2] sm:$0xff]  ;;  %v333_v4 = vld [vmem:[#allocation7] sm:$0xff]   ;;  %vm86_vm1 = vcmask 261120   ;;  %v335_v7 = vld [vmem:[#allocation7 + $0x10] sm:$0xff]  }
  0x38   :  { %303 = vmatprep.subr.bf16.mxu1 %v444_v0  ;;  %319 = vmatprep.mubr.msk.bf16.mxu1 %vm445_vm0, %v444_v0  ;;  %v62_v5 = vpack.c.bf16 %v61_v3, %v61_v3  ;;  %v334_v6 = vld [vmem:[#allocation7 + $0x8] sm:$0xff]   ;;  %v336_v8 = vld [vmem:[#allocation7 + $0x18] sm:$0xff]   ;;  %v337_v9 = vld [vmem:[#allocation7 + $0x20] sm:$0xff]  }
  0x39   :  { %296 = vmatpush3.bf16.msra.mxu0 %v331_v1  ;;  %304 = vmatpush3.bf16.msra.mxu1 %v333_v4  ;;  %v338_v10 = vld [vmem:[#allocation7 + $0x28] sm:$0xff]   ;;  %v339_v11 = vld [vmem:[#allocation7 + $0x30] sm:$0xff]   ;;  %v340_v12 = vld [vmem:[#allocation7 + $0x38] sm:$0xff]  }
  0x3a   :  { %297 = vmatprep.subr.bf16.mxu0 %v444_v0  ;;  %305 = vmatprep.subr.bf16.mxu1 %v444_v0  ;;  %v270_v13 = vld [vmem:[%s539_s2] ss:$0 sm:$0xff]  ;;  %s446_s2 = smov [#allocation8]  }
  0x3b   :  { %v274_v21 = vld [vmem:[%s541_s4] ss:$0 sm:$0xff]  ;;  %s260_s7 = sshll.u32 %s446_s2, 4  ;;  %s261_s7 = int_to_ptr.vmem [resolvable:$true] %s260_s7 }
  0x3c   :  { %s411_s4 = scalar_lea.vmem %s261_s7, 128  ;;  %p416_p11 = scmp.lt.s32.totalorder %s261_s7, %s261_s7 }
  0x3d   :  { %298 = vmatpush3.bf16.msra.mxu0 %v332_v2  ;;  %306 = vmatpush3.bf16.msra.mxu1 %v334_v6  ;;  %p412_p10 = scmp.ne.s32.totalorder %s261_s7, %s411_s4  ;;  %p417_p12 = scmp.lt.s32.totalorder %s411_s4, %s411_s4 }
  0x3e   :  { %307 = vmatprep.subr.bf16.mxu1 %v444_v0 }
  0x3f   :  { %p418_p13 = por %p417_p12, %p416_p11 }
  0x40   :  { %300 = vmatmul.mubr.msk.bf16.vlgmr.msra.gmra.mrb[0].mxu0 %vm86_vm1, %v62_v5 }
  0x41   :  { %308 = vmatpush3.bf16.msra.mxu1 %v335_v7  ;;  %p419_p0 = pnand %p418_p13, %p412_p10 }
  0x42   :  { %309 = vmatprep.subr.bf16.mxu1 %v444_v0 }
  0x45   :  { %310 = vmatpush3.bf16.msra.mxu1 %v336_v8 }
  0x46   :  { %311 = vmatprep.subr.bf16.mxu1 %v444_v0 }
  0x49   :  { %312 = vmatpush3.bf16.msra.mxu1 %v337_v9 }
  0x4a   :  { %313 = vmatprep.subr.bf16.mxu1 %v444_v0 }
  0x4d   :  { %314 = vmatpush3.bf16.msra.mxu1 %v338_v10 }
  0x4e   :  { %315 = vmatprep.subr.bf16.mxu1 %v444_v0 }
  0x51   :  { %316 = vmatpush3.bf16.msra.mxu1 %v339_v11 }
  0x52   :  { %317 = vmatprep.subr.bf16.mxu1 %v444_v0 }
  0x55   :  { %318 = vmatpush3.bf16.msra.mxu1 %v340_v12 }
 0x113   :  { %v124_v14 = vpop.f32.mrb[0].mxu0 }
 0x114   :  { %v125_v15 = vadd.f32 %v270_v13, %v124_v14  ;;  %v301_v16 = vpop.f32.mrb[1].mxu0 }
 0x115   :  { %v127_v17 = vpop.f32.mrb[2].mxu0 }
 0x116   :  { %v130_v18 = vmax.f32 %v125_v15, 0.0  ;;  %v302_v19 = vpop.f32.mrb[3].mxu0 }
 0x118   :  { %v131_v20 = vpack.c.bf16 %v130_v18, %v130_v18 }
 0x11a   :  { %320 = vmatmul.mubr.bf16.vlgmr.msra.gmra.mrb[0].mxu1 %v131_v20 }
 0x1ed   :  { %v237_v22 = vpop.f32.mrb[0].mxu1 }
 0x1ee   :  { %v238_v23 = vadd.f32 %v274_v21, %v237_v22  ;;  %v321_v24 = vpop.f32.mrb[1].mxu1 }
 0x1ef   :  { %v240_v25 = vpop.f32.mrb[2].mxu1 }
 0x1f0   :  { %243 = vmax.xlane.f32.xlu0 %v238_v23  ;;  %v322_v26 = vpop.f32.mrb[3].mxu1 }
 0x27d   :  { %v244_v27 = vpop.xlane.xlu0 %243 }
 0x27e   :  { %v245_v28 = vsub.f32 %v238_v23, %v244_v27 }
 0x280   :  { %v246_v29 = vmul.f32 1.442695, %v245_v28 }
 0x282   :  { %341 = vpow2.f32 %v246_v29 }
 0x28c   :  { %v342_v30 = vpop.eup %341 }
 0x28d   :  { %248 = vadd.xlane.f32.xlu0 %v342_v30 }
 0x31a   :  { %v249_v31 = vpop.xlane.xlu0 %248 }
 0x31b   :  { %343 = vrcp.f32 %v249_v31 }
 0x325   :  { %v344_v32 = vpop.eup %343 }
 0x326   :  { %v252_v33 = vmul.f32 %v344_v32, %v342_v30 }
 0x328   :  { %253 = vst [vmem:[#allocation8] sm:$0xff] %v252_v33 }
 0x329   :  { %422 = shalt.err (!%p419_p0)
}
 0x32a   :  { %s423_s10 = scalar_lea.hbm %s542_s5, 128 }
 0x32b   :  { %p424_p1 = scmp.ne.s32.totalorder %s542_s5, %s423_s10  ;;  %p427_p2 = scmp.lt.u32.totalorder %s423_s10, %s542_s5 }
 0x32d   :  { %p429_p3 = pnand %p427_p2, %p424_p1 }
 0x32f   :  { %432 = shalt.err (!%p429_p3)
}
 0x330   :  { %263 = dma.vmem_to_hbm [thread:$0]  %s261_s7, 128, %s542_s5, [#allocation4]  }
 0x331   :  { %437 = dma.done.wait [#allocation4], 128  }
 0x332   :  { %438 = vsyncadd [#allocation4], 4294967168 }
 0x333   :  { %267 = vsyncpa [#allocation3], 1 }
 0x334   :  { %268 = vsyncpa [#allocation6], 1 }
 0x335   :  { %269 = vsyncpa [#allocation4], 1 }

</bundles_post_ra>
